<compile_context>
chip_gen: v6e
topology: v6e:2x2x1
jax: 0.10.0
libtpu: 0.0.40
codegen_flags: <defaults>
</compile_context>

<pallas_src>
import functools

import jax
import jax.numpy as jnp
from jax.experimental import pallas as pl
from jax.experimental.pallas import tpu as pltpu

_BM_CAP = 4096  # rows per batch tile for large n (multiple of 8, fits VMEM)


def _round_up(x, m):
    return ((x + m - 1) // m) * m


def _mlp_hetero_kernel(z_ref, w1_ref, b1_ref, w2_ref, b2_ref,
                       w3m_ref, b3m_ref, w3s_ref, b3s_ref,
                       mu_ref, sigma_ref, *, min_sigma):
    # Hoist the (1, H) bias loads once per invocation.
    b1 = b1_ref[...]
    b2 = b2_ref[...]
    b3m = b3m_ref[...]
    b3s = b3s_ref[...]

    # Layer 1: (bm, in_dim) @ (in_dim, h1) + b1, ReLU   (MXU, f32 accumulation)
    h = jnp.dot(z_ref[...], w1_ref[...], preferred_element_type=jnp.float32)
    h = jnp.maximum(h + b1, 0.0)

    # Layer 2: (bm, h1) @ (h1, h2) + b2, ReLU
    h = h.astype(w2_ref.dtype)  # no-op in f32; keeps native bf16 MXU path otherwise
    h = jnp.dot(h, w2_ref[...], preferred_element_type=jnp.float32)
    h = jnp.maximum(h + b2, 0.0)

    # Output heads: mu = h @ W_mu + b_mu ; sigma = softplus(h @ W_sig + b_sig) + eps
    h = h.astype(w3m_ref.dtype)
    mu = jnp.dot(h, w3m_ref[...], preferred_element_type=jnp.float32) + b3m
    raw = jnp.dot(h, w3s_ref[...], preferred_element_type=jnp.float32) + b3s
    sigma = jnp.logaddexp(raw, 0.0) + min_sigma  # stable softplus (f32, EUP)

    mu_ref[...] = mu.astype(mu_ref.dtype)
    sigma_ref[...] = sigma.astype(sigma_ref.dtype)


def nn_hetero_gaussian_forward(z, params, *, out_dim, min_sigma=1e-3, bm=None):
    """Returns (mu, sigma) of the diagonal Gaussian parameterised by the MLP.

    Inputs are used in their storage dtype (pass bf16-stored z/weights on
    v6e/v7x to halve input HBM traffic); MXU accumulation stays f32.
    """
    w1, b1, w2, b2, w3, b3 = params
    n, in_dim = z.shape
    h1 = w1.shape[1]
    h2 = w2.shape[1]
    two_out = w3.shape[1]
    assert two_out == 2 * out_dim

    # Split the output head once (tiny (h2, out_dim) / (1, out_dim) arrays) so
    # the kernel writes mu / sigma directly -- no post-kernel slice over the
    # full (n, 2*out_dim) result.
    w3m, w3s = w3[:, :out_dim], w3[:, out_dim:]
    b3m, b3s = b3[:, :out_dim], b3[:, out_dim:]

    # Tile selection: single block for small/medium n (no pointless grid
    # splitting); 4096-row tiles otherwise to amortize ~0.35us/step pipeline
    # overhead.  Ragged last blocks are masked on writeback by Pallas, so no
    # padding / trimming copies are needed.
    if bm is None:
        bm = n if n <= _BM_CAP else _BM_CAP
    else:
        bm = _round_up(bm, 8)  # keep user-supplied bm on the (8,128) rule
    grid = (pl.cdiv(n, bm),)

    # Grid-invariant specs for the eight constant operands: loaded once, resident.
    def const(shape):
        return pl.BlockSpec(shape, lambda *_: (0,) * len(shape))

    kernel = functools.partial(_mlp_hetero_kernel, min_sigma=min_sigma)

    mu, sigma = pl.pallas_call(
        kernel,
        out_shape=(jax.ShapeDtypeStruct((n, out_dim), jnp.float32),
                   jax.ShapeDtypeStruct((n, out_dim), jnp.float32)),
        grid_spec=pltpu.PrefetchScalarGridSpec(
            num_scalar_prefetch=0,
            grid=grid,
            in_specs=[
                pl.BlockSpec((bm, in_dim), lambda i: (i, 0)),  # z tile
                const((in_dim, h1)),                           # w1
                const((1, h1)),                                # b1
                const((h1, h2)),                               # w2
                const((1, h2)),                                # b2
                const((h2, out_dim)),                          # w3 (mu head)
                const((1, out_dim)),                           # b3 (mu head)
                const((h2, out_dim)),                          # w3 (sigma head)
                const((1, out_dim)),                           # b3 (sigma head)
            ],
            out_specs=[pl.BlockSpec((bm, out_dim), lambda i: (i, 0)),
                       pl.BlockSpec((bm, out_dim), lambda i: (i, 0))],
        ),
        compiler_params=pltpu.CompilerParams(
            dimension_semantics=("parallel",)),
    )(z, w1, b1, w2, b2, w3m, b3m, w3s, b3s)

    return mu, sigma


def init_params(key, in_dim, out_dim, hidden_dims=(64, 64)):
    """Deterministic Xavier-normal weights, zero biases (matches LinearNN init).

    Weights are stored (fan_in, fan_out) so the kernel computes z @ W + b,
    equivalent to nn.Linear's x @ W.T with W of shape (out, in).
    """
    dims = [in_dim, *hidden_dims, 2 * out_dim]
    params = []
    for i in range(len(dims) - 1):
        key, sub = jax.random.split(key)
        fan_in, fan_out = dims[i], dims[i + 1]
        std = (2.0 / (fan_in + fan_out)) ** 0.5
        w = std * jax.random.normal(sub, (fan_in, fan_out), dtype=jnp.float32)
        b = jnp.zeros((1, fan_out), dtype=jnp.float32)
        params += [w, b]
    return tuple(params)


def reference_forward(z, params, *, out_dim, min_sigma=1e-3):
    w1, b1, w2, b2, w3, b3 = params
    h = jnp.maximum(z @ w1 + b1, 0.0)
    h = jnp.maximum(h @ w2 + b2, 0.0)
    out = h @ w3 + b3
    mu = out[:, :out_dim]
    sigma = jax.nn.softplus(out[:, out_dim:]) + min_sigma
    return mu, sigma


if __name__ == "__main__":
    key = jax.random.PRNGKey(0)
    in_dim, out_dim = 32, 16
    n = 16  # batch of latent samples

    pkey, zkey = jax.random.split(key)
    params = init_params(pkey, in_dim, out_dim, hidden_dims=(64, 64))
    z = jax.random.normal(zkey, (n, in_dim), dtype=jnp.float32)

    mu, sigma = nn_hetero_gaussian_forward(z, params, out_dim=out_dim,
                                           min_sigma=1e-3)
    jax.block_until_ready((mu, sigma))

    mu_ref, sigma_ref = reference_forward(z, params, out_dim=out_dim,
                                          min_sigma=1e-3)
    assert mu.shape == (n, out_dim) and sigma.shape == (n, out_dim)
    assert jnp.allclose(mu, mu_ref, atol=1e-5, rtol=1e-5)
    assert jnp.allclose(sigma, sigma_ref, atol=1e-5, rtol=1e-5)
    assert jnp.all(sigma > 0)

    # Non-multiple-of-8 batch, single-block (grid=1) path.
    n2 = 300
    z2 = jax.random.normal(jax.random.PRNGKey(1), (n2, in_dim), dtype=jnp.float32)
    mu2, sigma2 = nn_hetero_gaussian_forward(z2, params, out_dim=out_dim,
                                             min_sigma=1e-3)
    jax.block_until_ready((mu2, sigma2))
    mu2_ref, sigma2_ref = reference_forward(z2, params, out_dim=out_dim,
                                            min_sigma=1e-3)
    assert jnp.allclose(mu2, mu2_ref, atol=1e-5, rtol=1e-5)
    assert jnp.allclose(sigma2, sigma2_ref, atol=1e-5, rtol=1e-5)

    # Multi-block path with a ragged last block (explicit small bm): checks the
    # masked-writeback handling that replaces the old pad/trim wrapper copies.
    mu3, sigma3 = nn_hetero_gaussian_forward(z2, params, out_dim=out_dim,
                                             min_sigma=1e-3, bm=128)
    jax.block_until_ready((mu3, sigma3))
    assert jnp.allclose(mu3, mu2_ref, atol=1e-5, rtol=1e-5)
    assert jnp.allclose(sigma3, sigma2_ref, atol=1e-5, rtol=1e-5)

    # TODO(synk): Normal(mu, sigma).log_prob / sampling left in plain JAX; the
    # kernel returns the distribution parameters (mu, sigma).
    print("KERNEL_OK")
</pallas_src>

<mosaic_0001>
module attributes {stable_mosaic.version = 11 : i64} {
  func.func @_mlp_hetero_kernel(%arg0: i32, %arg1: memref<16x32xf32, #tpu.memory_space<vmem>>, %arg2: memref<32x64xf32, #tpu.memory_space<vmem>>, %arg3: memref<1x64xf32, #tpu.memory_space<vmem>>, %arg4: memref<64x64xf32, #tpu.memory_space<vmem>>, %arg5: memref<1x64xf32, #tpu.memory_space<vmem>>, %arg6: memref<64x16xf32, #tpu.memory_space<vmem>>, %arg7: memref<1x16xf32, #tpu.memory_space<vmem>>, %arg8: memref<64x16xf32, #tpu.memory_space<vmem>>, %arg9: memref<1x16xf32, #tpu.memory_space<vmem>>, %arg10: memref<16x16xf32, #tpu.memory_space<vmem>>, %arg11: memref<16x16xf32, #tpu.memory_space<vmem>>) attributes {dimension_semantics = [#tpu.dimension_semantics<parallel>], iteration_bounds = array<i64: 1>, scalar_prefetch = 0 : i64, scratch_operands = 0 : i64, tpu.core_type = #tpu.core_type<tc>, window_params = [{transform_indices = @transform_0, window_bounds = array<i64: 16, 32>}, {pipeline_mode = #tpu.pipeline_mode<synchronous>, transform_indices = @transform_1, window_bounds = array<i64: 32, 64>}, {pipeline_mode = #tpu.pipeline_mode<synchronous>, transform_indices = @transform_2, window_bounds = array<i64: 1, 64>}, {pipeline_mode = #tpu.pipeline_mode<synchronous>, transform_indices = @transform_3, window_bounds = array<i64: 64, 64>}, {pipeline_mode = #tpu.pipeline_mode<synchronous>, transform_indices = @transform_4, window_bounds = array<i64: 1, 64>}, {pipeline_mode = #tpu.pipeline_mode<synchronous>, transform_indices = @transform_5, window_bounds = array<i64: 64, 16>}, {pipeline_mode = #tpu.pipeline_mode<synchronous>, transform_indices = @transform_6, window_bounds = array<i64: 1, 16>}, {pipeline_mode = #tpu.pipeline_mode<synchronous>, transform_indices = @transform_7, window_bounds = array<i64: 64, 16>}, {pipeline_mode = #tpu.pipeline_mode<synchronous>, transform_indices = @transform_8, window_bounds = array<i64: 1, 16>}, {transform_indices = @transform_9, window_bounds = array<i64: 16, 16>}, {transform_indices = @transform_10, window_bounds = array<i64: 16, 16>}]} {
    %c0 = arith.constant 0 : index
    %c0_0 = arith.constant 0 : index
    %0 = vector.load %arg3[%c0, %c0_0] : memref<1x64xf32, #tpu.memory_space<vmem>>, vector<1x64xf32>
    %c0_1 = arith.constant 0 : index
    %c0_2 = arith.constant 0 : index
    %1 = vector.load %arg5[%c0_1, %c0_2] : memref<1x64xf32, #tpu.memory_space<vmem>>, vector<1x64xf32>
    %c0_3 = arith.constant 0 : index
    %c0_4 = arith.constant 0 : index
    %2 = vector.load %arg7[%c0_3, %c0_4] : memref<1x16xf32, #tpu.memory_space<vmem>>, vector<1x16xf32>
    %c0_5 = arith.constant 0 : index
    %c0_6 = arith.constant 0 : index
    %3 = vector.load %arg9[%c0_5, %c0_6] : memref<1x16xf32, #tpu.memory_space<vmem>>, vector<1x16xf32>
    %c0_7 = arith.constant 0 : index
    %c0_8 = arith.constant 0 : index
    %4 = vector.load %arg1[%c0_7, %c0_8] : memref<16x32xf32, #tpu.memory_space<vmem>>, vector<16x32xf32>
    %c0_9 = arith.constant 0 : index
    %c0_10 = arith.constant 0 : index
    %5 = vector.load %arg2[%c0_9, %c0_10] : memref<32x64xf32, #tpu.memory_space<vmem>>, vector<32x64xf32>
    %cst = arith.constant dense<0.000000e+00> : vector<16x64xf32>
    %6 = tpu.matmul %4, %5, %cst {dimension_numbers = #tpu.dot_dimension_numbers<[1], [0], [0], [1], [0, 0, 1, 1], [], []>} : vector<16x32xf32>, vector<32x64xf32>, vector<16x64xf32> -> vector<16x64xf32>
    %7 = vector.broadcast %0 : vector<1x64xf32> to vector<16x64xf32>
    %8 = arith.addf %6, %7 : vector<16x64xf32>
    %cst_11 = arith.constant 0.000000e+00 : f32
    %9 = vector.broadcast %cst_11 : f32 to vector<16x64xf32>
    %10 = arith.maximumf %8, %9 : vector<16x64xf32>
    %c0_12 = arith.constant 0 : index
    %c0_13 = arith.constant 0 : index
    %11 = vector.load %arg4[%c0_12, %c0_13] : memref<64x64xf32, #tpu.memory_space<vmem>>, vector<64x64xf32>
    %cst_14 = arith.constant dense<0.000000e+00> : vector<16x64xf32>
    %12 = tpu.matmul %10, %11, %cst_14 {dimension_numbers = #tpu.dot_dimension_numbers<[1], [0], [0], [1], [0, 0, 1, 1], [], []>} : vector<16x64xf32>, vector<64x64xf32>, vector<16x64xf32> -> vector<16x64xf32>
    %13 = vector.broadcast %1 : vector<1x64xf32> to vector<16x64xf32>
    %14 = arith.addf %12, %13 : vector<16x64xf32>
    %cst_15 = arith.constant 0.000000e+00 : f32
    %15 = vector.broadcast %cst_15 : f32 to vector<16x64xf32>
    %16 = arith.maximumf %14, %15 : vector<16x64xf32>
    %c0_16 = arith.constant 0 : index
    %c0_17 = arith.constant 0 : index
    %17 = vector.load %arg6[%c0_16, %c0_17] : memref<64x16xf32, #tpu.memory_space<vmem>>, vector<64x16xf32>
    %cst_18 = arith.constant dense<0.000000e+00> : vector<16x16xf32>
    %18 = tpu.matmul %16, %17, %cst_18 {dimension_numbers = #tpu.dot_dimension_numbers<[1], [0], [0], [1], [0, 0, 1, 1], [], []>} : vector<16x64xf32>, vector<64x16xf32>, vector<16x16xf32> -> vector<16x16xf32>
    %19 = vector.broadcast %2 : vector<1x16xf32> to vector<16x16xf32>
    %20 = arith.addf %18, %19 : vector<16x16xf32>
    %c0_19 = arith.constant 0 : index
    %c0_20 = arith.constant 0 : index
    %21 = vector.load %arg8[%c0_19, %c0_20] : memref<64x16xf32, #tpu.memory_space<vmem>>, vector<64x16xf32>
    %cst_21 = arith.constant dense<0.000000e+00> : vector<16x16xf32>
    %22 = tpu.matmul %16, %21, %cst_21 {dimension_numbers = #tpu.dot_dimension_numbers<[1], [0], [0], [1], [0, 0, 1, 1], [], []>} : vector<16x64xf32>, vector<64x16xf32>, vector<16x16xf32> -> vector<16x16xf32>
    %23 = vector.broadcast %3 : vector<1x16xf32> to vector<16x16xf32>
    %24 = arith.addf %22, %23 : vector<16x16xf32>
    %cst_22 = arith.constant 0.000000e+00 : f32
    %25 = vector.broadcast %cst_22 : f32 to vector<16x16xf32>
    %26 = arith.maximumf %24, %25 : vector<16x16xf32>
    %27 = vector.broadcast %cst_22 : f32 to vector<16x16xf32>
    %28 = arith.subf %24, %27 : vector<16x16xf32>
    %29 = arith.cmpf one, %28, %28 : vector<16x16xf32>
    %30 = vector.broadcast %cst_22 : f32 to vector<16x16xf32>
    %31 = arith.addf %24, %30 : vector<16x16xf32>
    %32 = math.absf %28 : vector<16x16xf32>
    %cst_23 = arith.constant 0.000000e+00 : f32
    %33 = vector.broadcast %cst_23 : f32 to vector<16x16xf32>
    %34 = arith.subf %33, %32 : vector<16x16xf32>
    %35 = math.exp %34 : vector<16x16xf32>
    %36 = math.log1p %35 : vector<16x16xf32>
    %37 = arith.addf %26, %36 : vector<16x16xf32>
    %38 = arith.select %29, %31, %37 : vector<16x16xi1>, vector<16x16xf32>
    %cst_24 = arith.constant 1.000000e-03 : f32
    %39 = vector.broadcast %cst_24 : f32 to vector<16x16xf32>
    %40 = arith.addf %38, %39 : vector<16x16xf32>
    %c0_25 = arith.constant 0 : index
    %c0_26 = arith.constant 0 : index
    %41 = vector.load %arg10[%c0_25, %c0_26] : memref<16x16xf32, #tpu.memory_space<vmem>>, vector<16x16xf32>
    tpu.vector_store %arg10[%c0_25, %c0_26], %20 {strides = array<i32>} : memref<16x16xf32, #tpu.memory_space<vmem>>, vector<16x16xf32>,
    %c0_27 = arith.constant 0 : index
    %c0_28 = arith.constant 0 : index
    %42 = vector.load %arg11[%c0_27, %c0_28] : memref<16x16xf32, #tpu.memory_space<vmem>>, vector<16x16xf32>
    tpu.vector_store %arg11[%c0_27, %c0_28], %40 {strides = array<i32>} : memref<16x16xf32, #tpu.memory_space<vmem>>, vector<16x16xf32>,
    return
  }
  func.func @transform_0(%arg0: i32) -> (i32, i32) {
    %c0_i32 = arith.constant 0 : i32
    %c0_i32_0 = arith.constant 0 : i32
    return %arg0, %c0_i32 : i32, i32
  }
  func.func @transform_1(%arg0: i32) -> (i32, i32) {
    %c0_i32 = arith.constant 0 : i32
    %c0_i32_0 = arith.constant 0 : i32
    %c0_i32_1 = arith.constant 0 : i32
    return %c0_i32, %c0_i32_0 : i32, i32
  }
  func.func @transform_2(%arg0: i32) -> (i32, i32) {
    %c0_i32 = arith.constant 0 : i32
    %c0_i32_0 = arith.constant 0 : i32
    %c0_i32_1 = arith.constant 0 : i32
    return %c0_i32, %c0_i32_0 : i32, i32
  }
  func.func @transform_3(%arg0: i32) -> (i32, i32) {
    %c0_i32 = arith.constant 0 : i32
    %c0_i32_0 = arith.constant 0 : i32
    %c0_i32_1 = arith.constant 0 : i32
    return %c0_i32, %c0_i32_0 : i32, i32
  }
  func.func @transform_4(%arg0: i32) -> (i32, i32) {
    %c0_i32 = arith.constant 0 : i32
    %c0_i32_0 = arith.constant 0 : i32
    %c0_i32_1 = arith.constant 0 : i32
    return %c0_i32, %c0_i32_0 : i32, i32
  }
  func.func @transform_5(%arg0: i32) -> (i32, i32) {
    %c0_i32 = arith.constant 0 : i32
    %c0_i32_0 = arith.constant 0 : i32
    %c0_i32_1 = arith.constant 0 : i32
    return %c0_i32, %c0_i32_0 : i32, i32
  }
  func.func @transform_6(%arg0: i32) -> (i32, i32) {
    %c0_i32 = arith.constant 0 : i32
    %c0_i32_0 = arith.constant 0 : i32
    %c0_i32_1 = arith.constant 0 : i32
    return %c0_i32, %c0_i32_0 : i32, i32
  }
  func.func @transform_7(%arg0: i32) -> (i32, i32) {
    %c0_i32 = arith.constant 0 : i32
    %c0_i32_0 = arith.constant 0 : i32
    %c0_i32_1 = arith.constant 0 : i32
    return %c0_i32, %c0_i32_0 : i32, i32
  }
  func.func @transform_8(%arg0: i32) -> (i32, i32) {
    %c0_i32 = arith.constant 0 : i32
    %c0_i32_0 = arith.constant 0 : i32
    %c0_i32_1 = arith.constant 0 : i32
    return %c0_i32, %c0_i32_0 : i32, i32
  }
  func.func @transform_9(%arg0: i32) -> (i32, i32) {
    %c0_i32 = arith.constant 0 : i32
    %c0_i32_0 = arith.constant 0 : i32
    return %arg0, %c0_i32 : i32, i32
  }
  func.func @transform_10(%arg0: i32) -> (i32, i32) {
    %c0_i32 = arith.constant 0 : i32
    %c0_i32_0 = arith.constant 0 : i32
    return %arg0, %c0_i32 : i32, i32
  }
}

</mosaic_0001>

<bundles_post_ra>
// kernel: tpu_custom_call.1
= control target key start
LH: loop header
LB: loop body
LE: loop exit
PB: predicated region body
PF: predicated region fallthrough
CT: control target
= control target key end

     0   :  { %16 = vsyncpa [#allocation3], 0  ;;  %vm52_vm0 = vcmask 261120   ;;  %s850_s0 = inlined_call_operand.vmem [shape: f32[16,32], index: 0, kind: input, shape index: {}]   ;;  %s851_s1 = inlined_call_operand.vmem [shape: f32[32,64], index: 1, kind: input, shape index: {}]   ;;  %s852_s2 = inlined_call_operand.vmem [shape: f32[1,64], index: 2, kind: input, shape index: {}]   ;;  %s853_s3 = inlined_call_operand.vmem [shape: f32[64,64], index: 3, kind: input, shape index: {}]   ;;  %s854_s4 = inlined_call_operand.vmem [shape: f32[1,64], index: 4, kind: input, shape index: {}]   ;;  %s855_s5 = inlined_call_operand.vmem [shape: f32[64,16], index: 5, kind: input, shape index: {}]   ;;  %s856_s6 = inlined_call_operand.vmem [shape: f32[1,16], index: 6, kind: input, shape index: {}]   ;;  %s857_s7 = inlined_call_operand.vmem [shape: f32[64,16], index: 7, kind: input, shape index: {}]   ;;  %s858_s8 = inlined_call_operand.vmem [shape: f32[1,16], index: 8, kind: input, shape index: {}]   ;;  %s859_s9 = inlined_call_operand.hbm [shape: f32[16,16], index: 9, kind: output, shape index: {0}]   ;;  %s860_s10 = inlined_call_operand.hbm [shape: f32[16,16], index: 10, kind: output, shape index: {1}]  }
   0x1   :  { %v45_v0 = vld [vmem:[%s851_s1 + $0x18] sm:$0xff]  ;;  %v44_v1 = vld [vmem:[%s851_s1 + $0x10] sm:$0xff]  ;;  %v40_v2 = vld [vmem:[%s850_s0] sm:$0xff] }
   0x2   :  { %541 = vmatprep.subr.mxu0 %v45_v0  ;;  %v43_v3 = vld [vmem:[%s851_s1 + $0x8] sm:$0xff]  ;;  %549 = vmatprep.mubr.msk.f32.mxu0 %vm52_vm0, %v40_v2  ;;  %v143_v4 = vld [vmem:[%s853_s3 + $0x38] sm:$0xff]  ;;  %v142_v5 = vld [vmem:[%s853_s3 + $0x30] sm:$0xff] }
   0x3   :  { %542 = vmatpush3.msra.mxu0 %v45_v0  ;;  %552 = vmatprep.subr.mxu1 %v143_v4 }
   0x4   :  { %543 = vmatprep.subr.mxu0 %v44_v1 }
   0x5   :  { %17 = vsyncpa [#allocation5], 0  ;;  %544 = vmatpush3.msra.mxu0 %v44_v1  ;;  %v42_v6 = vld [vmem:[%s851_s1] sm:$0xff]  ;;  %553 = vmatpush3.msra.mxu1 %v143_v4  ;;  %v141_v7 = vld [vmem:[%s853_s3 + $0x28] sm:$0xff]  ;;  %vm150_vm1 = vcmask 523264   ;;  %s665_s11 = smov [#allocation2]  }
   0x6   :  { %545 = vmatprep.subr.mxu0 %v43_v3  ;;  %554 = vmatprep.subr.mxu1 %v142_v5  ;;  %v41_v8 = vld [vmem:[%s850_s0 + $0x8] sm:$0xff]  ;;  %v140_v9 = vld [vmem:[%s853_s3 + $0x20] sm:$0xff]  ;;  %v139_v10 = vld [vmem:[%s853_s3 + $0x18] sm:$0xff]  ;;  %s466_s12 = sshll.u32 %s665_s11, 4  ;;  %vm456_vm2 = vcmask 130048   ;;  %s467_s12 = int_to_ptr.vmem [resolvable:$true] %s466_s12 }
   0x7   :  { %546 = vmatpush3.msra.mxu0 %v43_v3  ;;  %555 = vmatpush3.msra.mxu1 %v142_v5  ;;  %v138_v11 = vld [vmem:[%s853_s3 + $0x10] sm:$0xff]  ;;  %v137_v12 = vld [vmem:[%s853_s3 + $0x8] sm:$0xff]  ;;  %v136_v13 = vld [vmem:[%s853_s3] sm:$0xff]  ;;  %p626_p1 = scmp.lt.s32.totalorder %s467_s12, %s467_s12 }
   0x8   :  { %547 = vmatprep.subr.mxu0 %v42_v6  ;;  %556 = vmatprep.subr.mxu1 %v141_v7  ;;  %v241_v14 = vld [vmem:[%s855_s5 + $0x38] sm:$0xff]  ;;  %v240_v16 = vld [vmem:[%s855_s5 + $0x30] sm:$0xff]  ;;  %v239_v17 = vld [vmem:[%s855_s5 + $0x28] sm:$0xff] }
   0x9   :  { %548 = vmatpush3.msra.mxu0 %v42_v6  ;;  %557 = vmatpush3.msra.mxu1 %v141_v7  ;;  %v336_v15 = vld [vmem:[%s857_s7 + $0x38] sm:$0xff]  ;;  %v238_v18 = vld [vmem:[%s855_s5 + $0x20] sm:$0xff]  ;;  %v335_v26 = vld [vmem:[%s857_s7 + $0x30] sm:$0xff] }
   0xa   :  { %550 = vmatmul.mubr.msk.f32.vlgmr.msra.gmra.mxu0 %vm52_vm0, %v41_v8  ;;  %558 = vmatprep.subr.mxu1 %v140_v9  ;;  %v493_v19 = vld [vmem:[%s852_s2] ss:$0 sm:$0xff]  ;;  %v334_v27 = vld [vmem:[%s857_s7 + $0x28] sm:$0xff]  ;;  %v237_v29 = vld [vmem:[%s855_s5 + $0x18] sm:$0xff] }
   0xb   :  { %559 = vmatpush3.msra.mxu1 %v140_v9  ;;  %571 = vmatprep.subr.mxu0 %v241_v14  ;;  %v333_v28 = vld [vmem:[%s857_s7 + $0x20] sm:$0xff]  ;;  %v332_v30 = vld [vmem:[%s857_s7 + $0x18] sm:$0xff]  ;;  %v236_v31 = vld [vmem:[%s855_s5 + $0x10] sm:$0xff] }
   0xc   :  { %560 = vmatprep.subr.mxu1 %v139_v10  ;;  %572 = vmatpush3.msra.mxu0 %v241_v14  ;;  %v331_v32 = vld [vmem:[%s857_s7 + $0x10] sm:$0xff]  ;;  %v235_v33 = vld [vmem:[%s855_s5 + $0x8] sm:$0xff]  ;;  %v234_v35 = vld [vmem:[%s855_s5] sm:$0xff] }
   0xd   :  { %561 = vmatpush3.msra.mxu1 %v139_v10  ;;  %573 = vmatprep.subr.mxu0 %v240_v16  ;;  %v330_v34 = vld [vmem:[%s857_s7 + $0x8] sm:$0xff]  ;;  %v329_v36 = vld [vmem:[%s857_s7] sm:$0xff] }
   0xe   :  { %562 = vmatprep.subr.mxu1 %v138_v11  ;;  %574 = vmatpush3.msra.mxu0 %v240_v16  ;;  %v496_v37 = vld [vmem:[%s854_s4] ss:$0 sm:$0xff] }
   0xf   :  { %563 = vmatpush3.msra.mxu1 %v138_v11  ;;  %575 = vmatprep.subr.mxu0 %v239_v17  ;;  %v499_v44 = vld [vmem:[%s856_s6] ss:$0 sm:$0xff]  ;;  %s621_s6 = scalar_lea.vmem %s467_s12, 256 }
  0x10   :  { %564 = vmatprep.subr.mxu1 %v137_v12  ;;  %576 = vmatpush3.msra.mxu0 %v239_v17  ;;  %v502_v45 = vld [vmem:[%s858_s8] ss:$0 sm:$0xff]  ;;  %p622_p0 = scmp.ne.s32.totalorder %s467_s12, %s621_s6  ;;  %p627_p2 = scmp.lt.s32.totalorder %s621_s6, %s621_s6 }
  0x11   :  { %565 = vmatpush3.msra.mxu1 %v137_v12  ;;  %577 = vmatprep.subr.mxu0 %v238_v18 }
  0x12   :  { %566 = vmatprep.subr.mxu1 %v136_v13  ;;  %578 = vmatpush3.msra.mxu0 %v238_v18  ;;  %p628_p3 = por %p627_p2, %p626_p1 }
  0x13   :  { %567 = vmatpush3.msra.mxu1 %v136_v13  ;;  %579 = vmatprep.subr.mxu0 %v237_v29 }
  0x14   :  { %590 = vmatprep.subr.mxu1 %v336_v15  ;;  %580 = vmatpush3.msra.mxu0 %v237_v29  ;;  %p629_p4 = pnand %p628_p3, %p622_p0 }
  0x15   :  { %581 = vmatprep.subr.mxu0 %v236_v31 }
  0x16   :  { %582 = vmatpush3.msra.mxu0 %v236_v31 }
  0x17   :  { %583 = vmatprep.subr.mxu0 %v235_v33 }
  0x18   :  { %584 = vmatpush3.msra.mxu0 %v235_v33 }
  0x19   :  { %585 = vmatprep.subr.mxu0 %v234_v35 }
  0x1a   :  { %586 = vmatpush3.msra.mxu0 %v234_v35 }
  0xca   :  { %v551_v20 = vpop.f32.mrf.mxu0 }
  0xcb   :  { %v131_v21 = vadd.f32 %v551_v20, %v493_v19 }
  0xcc   :  { %v125_v22 = vpop.f32.mrf.mxu0 }
  0xcd   :  { %v126_v23 = vadd.f32 %v493_v19, %v125_v22  ;;  %v135_v25 = vmax.f32 %v131_v21, 0.0 }
  0xcf   :  { %v134_v24 = vmax.f32 %v126_v23, 0.0 }
  0xd1   :  { %568 = vmatprep.mubr.msk.f32.mxu1 %vm150_vm1, %v134_v24 }
  0xd2   :  { %569 = vmatmul.mubr.msk.f32.vlgmr.msra.gmra.mxu1 %vm150_vm1, %v135_v25 }
  0xd3   :  { %591 = vmatpush3.msra.mxu1 %v336_v15 }
  0xd4   :  { %592 = vmatprep.subr.mxu1 %v335_v26 }
  0xd5   :  { %593 = vmatpush3.msra.mxu1 %v335_v26 }
  0xd6   :  { %594 = vmatprep.subr.mxu1 %v334_v27 }
  0xd7   :  { %595 = vmatpush3.msra.mxu1 %v334_v27 }
  0xd8   :  { %596 = vmatprep.subr.mxu1 %v333_v28 }
  0xd9   :  { %597 = vmatpush3.msra.mxu1 %v333_v28 }
  0xda   :  { %598 = vmatprep.subr.mxu1 %v332_v30 }
  0xdb   :  { %599 = vmatpush3.msra.mxu1 %v332_v30 }
  0xdc   :  { %600 = vmatprep.subr.mxu1 %v331_v32 }
  0xdd   :  { %601 = vmatpush3.msra.mxu1 %v331_v32 }
  0xde   :  { %602 = vmatprep.subr.mxu1 %v330_v34 }
  0xdf   :  { %603 = vmatpush3.msra.mxu1 %v330_v34 }
  0xe0   :  { %604 = vmatprep.subr.mxu1 %v329_v36 }
  0xe1   :  { %605 = vmatpush3.msra.mxu1 %v329_v36 }
 0x192   :  { %v570_v38 = vpop.f32.mrf.mxu1 }
 0x193   :  { %v229_v39 = vadd.f32 %v570_v38, %v496_v37 }
 0x194   :  { %v223_v40 = vpop.f32.mrf.mxu1 }
 0x195   :  { %v224_v41 = vadd.f32 %v496_v37, %v223_v40  ;;  %v233_v43 = vmax.f32 %v229_v39, 0.0 }
 0x197   :  { %v232_v42 = vmax.f32 %v224_v41, 0.0 }
 0x199   :  { %587 = vmatprep.mubr.msk.f32.mxu0 %vm150_vm1, %v232_v42  ;;  %606 = vmatprep.mubr.msk.f32.mxu1 %vm150_vm1, %v232_v42 }
 0x19a   :  { %588 = vmatmul.mubr.msk.f32.vlgmr.msra.gmra.mxu0 %vm150_vm1, %v233_v43  ;;  %607 = vmatmul.mubr.msk.f32.vlgmr.msra.gmra.mxu1 %vm150_vm1, %v233_v43 }
 0x25a   :  { %v589_v46 = vpop.f32.mrf.mxu0  ;;  %v608_v47 = vpop.f32.mrf.mxu1 }
 0x25b   :  { %v326_v48 = vadd.f32 %v589_v46, %v499_v44  ;;  %v415_v49 = vadd.f32 %v608_v47, %v502_v45 }
 0x25c   :  { %v320_v50 = vpop.f32.mrf.mxu0  ;;  %v409_v51 = vpop.f32.mrf.mxu1 }
 0x25d   :  { %458 = vst.msk [vmem:[#allocation2 + $0x8] sm:$0xff] %vm456_vm2, %v326_v48  ;;  %v425_v52 = vand.u32 2147483647, %v415_v49  ;;  %v321_v53 = vadd.f32 %v499_v44, %v320_v50  ;;  %v410_v54 = vadd.f32 %v502_v45, %v409_v51 }
 0x25f   :  { %v427_v55 = vsub.f32 0.0, %v425_v52  ;;  %457 = vst.msk [vmem:[#allocation2] sm:$0xff] %vm456_vm2, %v321_v53  ;;  %v424_v56 = vand.u32 2147483647, %v410_v54 }
 0x260   :  { %632 = shalt.err (!%p629_p4)
}
 0x261   :  { %s666_s8 = smov 128   ;;  %s667_s1 = smov 8   ;;  %v430_v57 = vmul.f32 1.442695, %v427_v55  ;;  %v426_v58 = vsub.f32 0.0, %v424_v56  ;;  %v419_v9 = vmax.f32 %v415_v49, 0.0  ;;  %vm421_vm4 = vcmp.ne.f32.partialorder %v415_v49, %v415_v49 }
 0x262   :  { %472 = dma.vmem_to_hbm [thread:$0]  %s467_s12, 256, %s859_s9, [#allocation3], %s666_s8, %s666_s8, %s667_s1   ;;  %v418_v15 = vmax.f32 %v410_v54, 0.0  ;;  %vm420_vm6 = vcmp.ne.f32.partialorder %v410_v54, %v410_v54 }
 0x263   :  { %613 = vpow2.f32 %v430_v57  ;;  %v428_v59 = vmul.f32 1.442695, %v426_v58  ;;  %s668_s9 = smov [#allocation4]  }
 0x264   :  { %s478_s0 = sshll.u32 %s668_s9, 4  ;;  %s479_s0 = int_to_ptr.vmem [resolvable:$true] %s478_s0 }
 0x265   :  { %615 = vpow2.f32 %v428_v59  ;;  %s641_s14 = scalar_lea.vmem %s479_s0, 256  ;;  %p646_p6 = scmp.lt.s32.totalorder %s479_s0, %s479_s0 }
 0x266   :  { %p642_p5 = scmp.ne.s32.totalorder %s479_s0, %s641_s14  ;;  %p647_p7 = scmp.lt.s32.totalorder %s641_s14, %s641_s14 }
 0x268   :  { %p648_p8 = por %p647_p7, %p646_p6 }
 0x26a   :  { %p649_p9 = pnand %p648_p8, %p642_p5 }
 0x270   :  { %v614_v60 = vpop.eup %613 }
 0x271   :  { %v441_v61 = vadd.f32 1.0, %v614_v60  ;;  %v444_v0 = vmul.f32 -0.5, %v614_v60  ;;  %v447_v3 = vand.u32 2147483647, %v614_v60 }
 0x272   :  { %v616_v62 = vpop.eup %615 }
 0x273   :  { %617 = vlog2.f32 %v441_v61  ;;  %v432_v63 = vadd.f32 1.0, %v616_v62  ;;  %v435_v1 = vmul.f32 -0.5, %v616_v62  ;;  %v445_v2 = vadd.f32 1.0, %v444_v0 }
 0x274   :  { %v438_v8 = vand.u32 2147483647, %v616_v62  ;;  %vm448_vm3 = vcmp.lt.f32.partialorder %v447_v3, 0.0004427343 }
 0x275   :  { %619 = vlog2.f32 %v432_v63  ;;  %v436_v5 = vadd.f32 1.0, %v435_v1  ;;  %v446_v7 = vmul.f32 %v614_v60, %v445_v2 }
 0x276   :  { %vm439_vm5 = vcmp.lt.f32.partialorder %v438_v8, 0.0004427343 }
 0x277   :  { %v437_v14 = vmul.f32 %v616_v62, %v436_v5 }
 0x280   :  { %v618_v4 = vpop.eup %617 }
 0x281   :  { %v443_v6 = vmul.f32 0.6931472, %v618_v4 }
 0x282   :  { %v620_v10 = vpop.eup %619 }
 0x283   :  { %v449_v11 = vsel %vm448_vm3, %v446_v7, %v443_v6  ;;  %v434_v13 = vmul.f32 0.6931472, %v620_v10 }
 0x284   :  { %v451_v12 = vadd.f32 %v449_v11, %v419_v9 }
 0x285   :  { %v440_v17 = vsel %vm439_vm5, %v437_v14, %v434_v13 }
 0x286   :  { %v453_v16 = vsel %vm421_vm4, %v415_v49, %v451_v12  ;;  %v450_v19 = vadd.f32 %v440_v17, %v418_v15 }
 0x287   :  { %v455_v18 = vadd.f32 0.001, %v453_v16 }
 0x288   :  { %v452_v20 = vsel %vm420_vm6, %v410_v54, %v450_v19 }
 0x289   :  { %460 = vst.msk [vmem:[#allocation4 + $0x8] sm:$0xff] %vm456_vm2, %v455_v18  ;;  %v454_v21 = vadd.f32 0.001, %v452_v20 }
 0x28b   :  { %459 = vst.msk [vmem:[#allocation4] sm:$0xff] %vm456_vm2, %v454_v21 }
 0x28c   :  { %652 = shalt.err (!%p649_p9)
}
 0x28d   :  { %484 = dma.vmem_to_hbm [thread:$0]  %s479_s0, 256, %s860_s10, [#allocation5], %s666_s8, %s666_s8, %s667_s1  }
 0x28e   :  { %661 = dma.done.wait [#allocation3], 256  }
 0x28f   :  { %662 = vsyncadd [#allocation3], 4294967040 }
 0x290   :  { %663 = dma.done.wait [#allocation5], 256  }
 0x291   :  { %664 = vsyncadd [#allocation5], 4294967040 }
 0x292   :  { %491 = vsyncpa [#allocation3], 1 }
 0x293   :  { %492 = vsyncpa [#allocation5], 1 }

</bundles_post_ra>
